<compile_context>
chip_gen: v5e
topology: v5e:2x2
jax: 0.10.0
libtpu: 0.0.40
codegen_flags: <defaults>
</compile_context>

<pallas_src>
import functools

import numpy as np

import jax
import jax.numpy as jnp
from jax import lax
from jax.experimental import pallas as pl
from jax.experimental.pallas import tpu as pltpu

_LANES = 128
_SUBLANES = 8
_CHUNK_ROWS = 64           # 64x128 f32 = 32 KiB inner chunk (8 vregs)
_MAX_TM = 2048             # 2048x128 f32 = 1 MiB tile; x2 buffered = 2 MiB VMEM


def _cdiv(a, b):
    return -(-a // b)


def _round_up(a, b):
    return _cdiv(a, b) * b


def _wsse_kernel(x_ref, t_ref, wm_ref, ws_ref, om_ref, os_ref, *, nchunks):
    """One grid step: weighted SSE partial sums of a (tm, 128) block.

    om/os get the (1, 8, 128) per-block partial sums of
        wm * (x - t)^2   and   ws * (x - t)^2
    where t / wm / ws are per-row (target, mpd-weight, msd-weight).  The
    weights already include the per-feature-map 1/n, so summing the outputs
    over all blocks gives mpd_loss / msd_loss directly.
    """
    def body(j, carry):
        acc_m, acc_s = carry
        r0 = pl.multiple_of(j * _CHUNK_ROWS, _CHUNK_ROWS)
        x = x_ref[pl.ds(r0, _CHUNK_ROWS), :].astype(jnp.float32)
        t = t_ref[pl.ds(r0, _CHUNK_ROWS), :]
        wm = wm_ref[pl.ds(r0, _CHUNK_ROWS), :]
        ws = ws_ref[pl.ds(r0, _CHUNK_ROWS), :]
        d = x - t
        sq = d * d
        # (64,128) -> (8,8,128) summed over axis 0: pure vreg-wise VPU adds.
        pm = (wm * sq).reshape(_CHUNK_ROWS // _SUBLANES, _SUBLANES,
                               _LANES).sum(axis=0)
        ps = (ws * sq).reshape(_CHUNK_ROWS // _SUBLANES, _SUBLANES,
                               _LANES).sum(axis=0)
        return acc_m + pm, acc_s + ps

    zero = jnp.zeros((_SUBLANES, _LANES), jnp.float32)
    acc_m, acc_s = lax.fori_loop(0, nchunks, body, (zero, zero), unroll=True)
    om_ref[...] = acc_m[None]
    os_ref[...] = acc_s[None]


def _fused_group_sums(entries):
    """entries: list of (1-D array, target float, is_mpd bool), same dtype,
    all non-empty.  Returns (mpd_sum, msd_sum) where each is the sum of
    mean((x - target)^2) over the corresponding entries, computed by a single
    fused Pallas kernel launch."""
    dtype = entries[0][0].dtype

    x_pieces = []
    t_rows, wm_rows, ws_rows = [], [], []
    for flat, tgt, is_mpd in entries:
        n = int(flat.size)
        nrows = _cdiv(n, _LANES)
        pad = nrows * _LANES - n
        if pad:
            # Pad with the exact float target so padded elements add 0 SSE.
            flat = jnp.pad(flat, (0, pad), constant_values=tgt)
        x_pieces.append(flat)
        w = 1.0 / n
        t_rows.append(np.full(nrows, tgt, np.float32))
        wm_rows.append(np.full(nrows, w if is_mpd else 0.0, np.float32))
        ws_rows.append(np.full(nrows, 0.0 if is_mpd else w, np.float32))

    rows = sum(int(p.size) // _LANES for p in x_pieces)
    tm = min(_MAX_TM, _round_up(rows, _CHUNK_ROWS))
    total_rows = _round_up(rows, tm)
    tail = total_rows - rows
    if tail:
        # Global tail pad: zero data, zero weight -> contributes exactly 0.
        x_pieces.append(jnp.zeros(tail * _LANES, dtype=dtype))
        t_rows.append(np.zeros(tail, np.float32))
        wm_rows.append(np.zeros(tail, np.float32))
        ws_rows.append(np.zeros(tail, np.float32))

    x_all = jnp.concatenate(x_pieces).reshape(total_rows, _LANES)
    t_all = jnp.asarray(np.concatenate(t_rows)).reshape(total_rows, 1)
    wm_all = jnp.asarray(np.concatenate(wm_rows)).reshape(total_rows, 1)
    ws_all = jnp.asarray(np.concatenate(ws_rows)).reshape(total_rows, 1)

    num_blocks = total_rows // tm
    nchunks = tm // _CHUNK_ROWS

    out_m, out_s = pl.pallas_call(
        functools.partial(_wsse_kernel, nchunks=nchunks),
        out_shape=(
            jax.ShapeDtypeStruct((num_blocks, _SUBLANES, _LANES), jnp.float32),
            jax.ShapeDtypeStruct((num_blocks, _SUBLANES, _LANES), jnp.float32),
        ),
        grid=(num_blocks,),
        in_specs=[
            pl.BlockSpec((tm, _LANES), lambda i: (i, 0)),
            pl.BlockSpec((tm, 1), lambda i: (i, 0)),
            pl.BlockSpec((tm, 1), lambda i: (i, 0)),
            pl.BlockSpec((tm, 1), lambda i: (i, 0)),
        ],
        out_specs=(
            pl.BlockSpec((1, _SUBLANES, _LANES), lambda i: (i, 0, 0)),
            pl.BlockSpec((1, _SUBLANES, _LANES), lambda i: (i, 0, 0)),
        ),
        compiler_params=pltpu.CompilerParams(
            dimension_semantics=("parallel",)),
    )(x_all, t_all, wm_all, ws_all)

    return jnp.sum(out_m), jnp.sum(out_s)


def discriminator_loss(msd_target_features, mpd_target_features,
                       msd_generated_features, mpd_generated_features,
                       **batch):
    """Pallas-backed equivalent of DiscriminatorLoss.forward."""
    raw_entries = []   # (final feature map, target, is_mpd)
    for fg_msd, ft_msd, fg_mpd, ft_mpd in zip(msd_generated_features,
                                              msd_target_features,
                                              mpd_generated_features,
                                              mpd_target_features):
        raw_entries.append((ft_mpd[-1], 1.0, True))
        raw_entries.append((fg_mpd[-1], 0.0, True))
        raw_entries.append((ft_msd[-1], 1.0, False))
        raw_entries.append((fg_msd[-1], 0.0, False))

    mpd_loss = jnp.float32(0.0)
    msd_loss = jnp.float32(0.0)

    # Group by dtype so bf16 inputs are staged / DMA'd as bf16 (the f32 cast
    # happens in-kernel on the VPU); usually a single group -> one launch.
    groups = {}
    for a, tgt, is_mpd in raw_entries:
        a = jnp.asarray(a)
        if a.size == 0:
            # TODO(synk): torch MSELoss on an empty tensor yields NaN; empty
            # feature maps are skipped here (contribute 0) instead.
            continue
        groups.setdefault(jnp.dtype(a.dtype), []).append(
            (jnp.ravel(a), float(tgt), bool(is_mpd)))

    for ents in groups.values():
        m, s = _fused_group_sums(ents)
        mpd_loss = mpd_loss + m
        msd_loss = msd_loss + s

    return {
        'discriminator_loss': msd_loss + mpd_loss,
        'mpd_loss': mpd_loss,
        'msd_loss': msd_loss,
    }


def _reference_loss(msd_t, mpd_t, msd_g, mpd_g):
    """Plain-JAX reference matching the PyTorch module semantics."""
    mpd_loss = jnp.float32(0.0)
    msd_loss = jnp.float32(0.0)
    for fg_msd, ft_msd, fg_mpd, ft_mpd in zip(msd_g, msd_t, mpd_g, mpd_t):
        mpd_loss = (mpd_loss
                    + jnp.mean((ft_mpd[-1] - 1.0) ** 2)
                    + jnp.mean(fg_mpd[-1] ** 2))
        msd_loss = (msd_loss
                    + jnp.mean((ft_msd[-1] - 1.0) ** 2)
                    + jnp.mean(fg_msd[-1] ** 2))
    return {
        'discriminator_loss': msd_loss + mpd_loss,
        'mpd_loss': mpd_loss,
        'msd_loss': msd_loss,
    }


def _make_feats(key, batch, shapes):
    feats = []
    for shp in shapes:
        key, k1, k2 = jax.random.split(key, 3)
        inter = jax.random.normal(k1, (batch, 4, 16), dtype=jnp.float32)
        final = jax.random.normal(k2, shp, dtype=jnp.float32)
        feats.append([inter, final])
    return key, feats


def _run_case(key, batch, msd_shapes, mpd_shapes):
    key, msd_t = _make_feats(key, batch, msd_shapes)
    key, msd_g = _make_feats(key, batch, msd_shapes)
    key, mpd_t = _make_feats(key, batch, mpd_shapes)
    key, mpd_g = _make_feats(key, batch, mpd_shapes)

    out = discriminator_loss(msd_t, mpd_t, msd_g, mpd_g)
    out = jax.tree_util.tree_map(jax.block_until_ready, out)
    ref = _reference_loss(msd_t, mpd_t, msd_g, mpd_g)

    for k in ('discriminator_loss', 'mpd_loss', 'msd_loss'):
        assert jnp.allclose(out[k], ref[k], rtol=1e-5, atol=1e-5), (
            k, out[k], ref[k])
    return key


if __name__ == "__main__":
    key = jax.random.PRNGKey(0)

    # Case 1: tiny discriminator outputs (MSD: (B,1,T) 1-D conv style,
    # MPD: (B,1,T//p,p) 2-D conv style) — everything fits one small block.
    key = _run_case(
        key, 2,
        msd_shapes=[(2, 1, 200), (2, 1, 100), (2, 1, 50)],
        mpd_shapes=[(2, 1, 40, 2), (2, 1, 27, 3), (2, 1, 16, 5)])

    # Case 2: larger maps — exercises tm=2048 tiles, the multi-block
    # "parallel" grid, the global zero-weight tail, and chunked accumulation.
    key = _run_case(
        key, 1,
        msd_shapes=[(1, 1, 150000), (1, 1, 60000), (1, 1, 20000)],
        mpd_shapes=[(1, 1, 3000, 2), (1, 1, 2000, 3), (1, 1, 1200, 5)])

    print("KERNEL_OK")
</pallas_src>

<mosaic_0001>
module attributes {stable_mosaic.version = 11 : i64} {
  func.func @_wsse_kernel(%arg0: i32, %arg1: memref<64x128xf32, #tpu.memory_space<vmem>>, %arg2: memref<64x1xf32, #tpu.memory_space<vmem>>, %arg3: memref<64x1xf32, #tpu.memory_space<vmem>>, %arg4: memref<64x1xf32, #tpu.memory_space<vmem>>, %arg5: memref<1x8x128xf32, #tpu.memory_space<vmem>>, %arg6: memref<1x8x128xf32, #tpu.memory_space<vmem>>) attributes {dimension_semantics = [#tpu.dimension_semantics<parallel>], iteration_bounds = array<i64: 1>, scalar_prefetch = 0 : i64, scratch_operands = 0 : i64, tpu.core_type = #tpu.core_type<tc>, window_params = [{transform_indices = @transform_0, window_bounds = array<i64: 64, 128>}, {transform_indices = @transform_1, window_bounds = array<i64: 64, 1>}, {transform_indices = @transform_2, window_bounds = array<i64: 64, 1>}, {transform_indices = @transform_3, window_bounds = array<i64: 64, 1>}, {transform_indices = @transform_4, window_bounds = array<i64: 1, 8, 128>}, {transform_indices = @transform_5, window_bounds = array<i64: 1, 8, 128>}]} {
    %cst = arith.constant 0.000000e+00 : f32
    %0 = vector.broadcast %cst : f32 to vector<8x128xf32>
    %c0_i32 = arith.constant 0 : i32
    %c64_i32 = arith.constant 64 : i32
    %1 = arith.muli %c0_i32, %c64_i32 : i32
    %2 = tpu.assume_multiple %1, 64 : i32
    %3 = arith.index_cast %2 : i32 to index
    %c0 = arith.constant 0 : index
    %4 = vector.load %arg1[%3, %c0] : memref<64x128xf32, #tpu.memory_space<vmem>>, vector<64x128xf32>
    %5 = arith.index_cast %2 : i32 to index
    %c0_0 = arith.constant 0 : index
    %6 = vector.load %arg2[%5, %c0_0] : memref<64x1xf32, #tpu.memory_space<vmem>>, vector<64x1xf32>
    %7 = arith.index_cast %2 : i32 to index
    %c0_1 = arith.constant 0 : index
    %8 = vector.load %arg3[%7, %c0_1] : memref<64x1xf32, #tpu.memory_space<vmem>>, vector<64x1xf32>
    %9 = arith.index_cast %2 : i32 to index
    %c0_2 = arith.constant 0 : index
    %10 = vector.load %arg4[%9, %c0_2] : memref<64x1xf32, #tpu.memory_space<vmem>>, vector<64x1xf32>
    %11 = vector.broadcast %6 : vector<64x1xf32> to vector<64x128xf32>
    %12 = arith.subf %4, %11 : vector<64x128xf32>
    %13 = arith.mulf %12, %12 : vector<64x128xf32>
    %14 = vector.broadcast %8 : vector<64x1xf32> to vector<64x128xf32>
    %15 = arith.mulf %14, %13 : vector<64x128xf32>
    %16 = vector.shape_cast %15 : vector<64x128xf32> to vector<8x8x128xf32>
    %cst_3 = arith.constant dense<0.000000e+00> : vector<8x128xf32>
    %17 = vector.multi_reduction <add>, %16, %cst_3 [0] : vector<8x8x128xf32> to vector<8x128xf32>
    %18 = vector.broadcast %10 : vector<64x1xf32> to vector<64x128xf32>
    %19 = arith.mulf %18, %13 : vector<64x128xf32>
    %20 = vector.shape_cast %19 : vector<64x128xf32> to vector<8x8x128xf32>
    %cst_4 = arith.constant dense<0.000000e+00> : vector<8x128xf32>
    %21 = vector.multi_reduction <add>, %20, %cst_4 [0] : vector<8x8x128xf32> to vector<8x128xf32>
    %22 = arith.addf %0, %17 : vector<8x128xf32>
    %23 = arith.addf %0, %21 : vector<8x128xf32>
    %c1_i32 = arith.constant 1 : i32
    %24 = vector.shape_cast %22 : vector<8x128xf32> to vector<1x8x128xf32>
    %c0_5 = arith.constant 0 : index
    %c0_6 = arith.constant 0 : index
    %c0_7 = arith.constant 0 : index
    %25 = vector.load %arg5[%c0_5, %c0_6, %c0_7] : memref<1x8x128xf32, #tpu.memory_space<vmem>>, vector<1x8x128xf32>
    tpu.vector_store %arg5[%c0_5, %c0_6, %c0_7], %24 {strides = array<i32>} : memref<1x8x128xf32, #tpu.memory_space<vmem>>, vector<1x8x128xf32>,
    %26 = vector.shape_cast %23 : vector<8x128xf32> to vector<1x8x128xf32>
    %c0_8 = arith.constant 0 : index
    %c0_9 = arith.constant 0 : index
    %c0_10 = arith.constant 0 : index
    %27 = vector.load %arg6[%c0_8, %c0_9, %c0_10] : memref<1x8x128xf32, #tpu.memory_space<vmem>>, vector<1x8x128xf32>
    tpu.vector_store %arg6[%c0_8, %c0_9, %c0_10], %26 {strides = array<i32>} : memref<1x8x128xf32, #tpu.memory_space<vmem>>, vector<1x8x128xf32>,
    return
  }
  func.func @transform_0(%arg0: i32) -> (i32, i32) {
    %c0_i32 = arith.constant 0 : i32
    %c0_i32_0 = arith.constant 0 : i32
    return %arg0, %c0_i32 : i32, i32
  }
  func.func @transform_1(%arg0: i32) -> (i32, i32) {
    %c0_i32 = arith.constant 0 : i32
    %c0_i32_0 = arith.constant 0 : i32
    return %arg0, %c0_i32 : i32, i32
  }
  func.func @transform_2(%arg0: i32) -> (i32, i32) {
    %c0_i32 = arith.constant 0 : i32
    %c0_i32_0 = arith.constant 0 : i32
    return %arg0, %c0_i32 : i32, i32
  }
  func.func @transform_3(%arg0: i32) -> (i32, i32) {
    %c0_i32 = arith.constant 0 : i32
    %c0_i32_0 = arith.constant 0 : i32
    return %arg0, %c0_i32 : i32, i32
  }
  func.func @transform_4(%arg0: i32) -> (i32, i32, i32) {
    %c0_i32 = arith.constant 0 : i32
    %c0_i32_0 = arith.constant 0 : i32
    %c0_i32_1 = arith.constant 0 : i32
    return %arg0, %c0_i32, %c0_i32_0 : i32, i32, i32
  }
  func.func @transform_5(%arg0: i32) -> (i32, i32, i32) {
    %c0_i32 = arith.constant 0 : i32
    %c0_i32_0 = arith.constant 0 : i32
    %c0_i32_1 = arith.constant 0 : i32
    return %arg0, %c0_i32, %c0_i32_0 : i32, i32, i32
  }
}

</mosaic_0001>

<bundles_post_ra>
// kernel: tpu_custom_call.1
= control target key start
LH: loop header
LB: loop body
LE: loop exit
PB: predicated region body
PF: predicated region fallthrough
CT: control target
= control target key end

     0   :  { %11 = vsyncpa [#allocation3], 0  ;;  %v313_v3 = vmov 0   ;;  %s448_s0 = inlined_call_operand.vmem [shape: f32[64,128], index: 0, kind: input, shape index: {}]   ;;  %s449_s1 = inlined_call_operand.vmem [shape: f32[64,1], index: 1, kind: input, shape index: {}]   ;;  %s450_s2 = inlined_call_operand.vmem [shape: f32[64,1], index: 2, kind: input, shape index: {}]   ;;  %s451_s3 = inlined_call_operand.vmem [shape: f32[64,1], index: 3, kind: input, shape index: {}]   ;;  %s452_s4 = inlined_call_operand.hbm [shape: f32[1,8,128], index: 4, kind: output, shape index: {0}]   ;;  %s453_s5 = inlined_call_operand.hbm [shape: f32[1,8,128], index: 5, kind: output, shape index: {1}]  }
   0x1   :  { %v33_v0 = vld [vmem:[%s449_s1 + $0x20] sm:$0xff]  ;;  %v31_v1 = vld [vmem:[%s449_s1 + $0x10] sm:$0xff]  ;;  %260 = vset.pattern.permute.xlu2 %v313_v3  ;;  %259 = vset.pattern.permute.xlu1 %v313_v3 }
   0x2   :  { %v29_v2 = vld [vmem:[%s449_s1] sm:$0xff]  ;;  %258 = vset.pattern.permute.xlu0 %v313_v3  ;;  %75 = vperm.xlu2 %260, %v33_v0  }
   0x3   :  { %65 = vperm.xlu1 %259, %v31_v1   ;;  %55 = vperm.xlu0 %258, %v29_v2  }
   0x4   :  { %12 = vsyncpa [#allocation5], 0  ;;  %v34_v4 = vld [vmem:[%s449_s1 + $0x28] sm:$0xff]  ;;  %v32_v5 = vld [vmem:[%s449_s1 + $0x18] sm:$0xff]  ;;  %s230_s6 = sshll.u32 %s452_s4, 4  ;;  %s315_s7 = smov [#allocation4]   ;;  %s231_s6 = int_to_ptr.hbm [resolvable:$true] %s230_s6 }
   0x5   :  { %v30_v6 = vld [vmem:[%s449_s1 + $0x8] sm:$0xff]  ;;  %v37_v7 = vld [vmem:[%s450_s2] sm:$0xff]  ;;  %v36_v8 = vld [vmem:[%s449_s1 + $0x38] sm:$0xff]  ;;  %s239_s8 = sshll.u32 %s315_s7, 4  ;;  %s241_s11 = sshll.u32 %s453_s5, 4  ;;  %s240_s8 = int_to_ptr.vmem [resolvable:$true] %s239_s8  ;;  %s242_s11 = int_to_ptr.hbm [resolvable:$true] %s241_s11 }
   0x6   :  { %v35_v9 = vld [vmem:[%s449_s1 + $0x30] sm:$0xff]  ;;  %v40_v10 = vld [vmem:[%s450_s2 + $0x18] sm:$0xff]  ;;  %v38_v12 = vld [vmem:[%s450_s2 + $0x8] sm:$0xff] }
   0x7   :  { %v39_v11 = vld [vmem:[%s450_s2 + $0x10] sm:$0xff]  ;;  %v42_v14 = vld [vmem:[%s450_s2 + $0x28] sm:$0xff]  ;;  %v41_v15 = vld [vmem:[%s450_s2 + $0x20] sm:$0xff] }
   0x8   :  { %v43_v13 = vld [vmem:[%s450_s2 + $0x30] sm:$0xff]  ;;  %v46_v17 = vld [vmem:[%s451_s3 + $0x8] sm:$0xff]  ;;  %v45_v18 = vld [vmem:[%s451_s3] sm:$0xff] }
   0x9   :  { %v47_v16 = vld [vmem:[%s451_s3 + $0x10] sm:$0xff]  ;;  %v50_v19 = vld [vmem:[%s451_s3 + $0x28] sm:$0xff]  ;;  %v49_v20 = vld [vmem:[%s451_s3 + $0x20] sm:$0xff] }
   0xa   :  { %80 = vperm.xlu2 %260, %v34_v4   ;;  %v48_v21 = vld [vmem:[%s451_s3 + $0x18] sm:$0xff]  ;;  %v51_v24 = vld [vmem:[%s451_s3 + $0x30] sm:$0xff]  ;;  %v21_v38 = vld [vmem:[%s448_s0] sm:$0xff] }
   0xb   :  { %70 = vperm.xlu1 %259, %v32_v5   ;;  %60 = vperm.xlu0 %258, %v30_v6   ;;  %v52_v22 = vld [vmem:[%s451_s3 + $0x38] sm:$0xff]  ;;  %v22_v39 = vld [vmem:[%s448_s0 + $0x8] sm:$0xff]  ;;  %v23_v42 = vld [vmem:[%s448_s0 + $0x10] sm:$0xff] }
   0xc   :  { %v44_v23 = vld [vmem:[%s450_s2 + $0x38] sm:$0xff]  ;;  %v25_v51 = vld [vmem:[%s448_s0 + $0x20] sm:$0xff]  ;;  %v26_v63 = vld [vmem:[%s448_s0 + $0x28] sm:$0xff] }
   0xd   :  { %v24_v47 = vld [vmem:[%s448_s0 + $0x18] sm:$0xff]  ;;  %v27_v2 = vld [vmem:[%s448_s0 + $0x30] sm:$0xff] }
  0x12   :  { %111 = vperm.xlu2 %260, %v37_v7  }
  0x13   :  { %90 = vperm.xlu1 %259, %v36_v8   ;;  %85 = vperm.xlu0 %258, %v35_v9   ;;  %v28_v9 = vld [vmem:[%s448_s0 + $0x38] sm:$0xff]  ;;  %s314_s0 = smov [#allocation2]  }
  0x14   :  { %s228_s28 = sshll.u32 %s314_s0, 4  ;;  %s229_s28 = int_to_ptr.vmem [resolvable:$true] %s228_s28 }
  0x1a   :  { %126 = vperm.xlu2 %260, %v40_v10  }
  0x1b   :  { %121 = vperm.xlu1 %259, %v39_v11   ;;  %116 = vperm.xlu0 %258, %v38_v12  }
  0x22   :  { %141 = vperm.xlu2 %260, %v43_v13  }
  0x23   :  { %136 = vperm.xlu1 %259, %v42_v14   ;;  %131 = vperm.xlu0 %258, %v41_v15  }
  0x2a   :  { %176 = vperm.xlu2 %260, %v47_v16  }
  0x2b   :  { %171 = vperm.xlu1 %259, %v46_v17   ;;  %166 = vperm.xlu0 %258, %v45_v18  }
  0x32   :  { %191 = vperm.xlu2 %260, %v50_v19  }
  0x33   :  { %186 = vperm.xlu1 %259, %v49_v20   ;;  %181 = vperm.xlu0 %258, %v48_v21  }
  0x3a   :  { %201 = vperm.xlu2 %260, %v52_v22  }
  0x3b   :  { %146 = vperm.xlu1 %259, %v44_v23   ;;  %196 = vperm.xlu0 %258, %v51_v24  }
  0x5c   :  { %v76_v25 = vpop.permute.xlu2 %75 }
  0x5d   :  { %v97_v54 = vsub.f32 %v25_v51, %v76_v25 }
  0x5f   :  { %v105_v0 = vmul.f32 %v97_v54, %v97_v54 }
  0x64   :  { %v81_v26 = vpop.permute.xlu2 %80 }
  0x65   :  { %v98_v3 = vsub.f32 %v26_v63, %v81_v26 }
  0x67   :  { %v106_v14 = vmul.f32 %v98_v3, %v98_v3 }
  0x6c   :  { %v112_v29 = vpop.permute.xlu2 %111 }
  0x74   :  { %v127_v32 = vpop.permute.xlu2 %126 }
  0x75   :  { %v66_v27 = vpop.permute.xlu1 %65  ;;  %v56_v28 = vpop.permute.xlu0 %55 }
  0x76   :  { %v93_v40 = vsub.f32 %v21_v38, %v56_v28  ;;  %v95_v48 = vsub.f32 %v23_v42, %v66_v27 }
  0x78   :  { %v101_v45 = vmul.f32 %v93_v40, %v93_v40  ;;  %v103_v55 = vmul.f32 %v95_v48, %v95_v48 }
  0x7a   :  { %v149_v52 = vmul.f32 %v112_v29, %v101_v45 }
  0x7c   :  { %v142_v37 = vpop.permute.xlu2 %141 }
  0x7d   :  { %v71_v30 = vpop.permute.xlu1 %70  ;;  %v61_v31 = vpop.permute.xlu0 %60 }
  0x7e   :  { %v94_v41 = vsub.f32 %v22_v39, %v61_v31  ;;  %v96_v53 = vsub.f32 %v24_v47, %v71_v30 }
  0x80   :  { %v102_v46 = vmul.f32 %v94_v41, %v94_v41  ;;  %v104_v59 = vmul.f32 %v96_v53, %v96_v53 }
  0x82   :  { %v152_v4 = vmul.f32 %v127_v32, %v104_v59 }
  0x84   :  { %v177_v49 = vpop.permute.xlu2 %176 }
  0x85   :  { %v91_v33 = vpop.permute.xlu1 %90  ;;  %v86_v34 = vpop.permute.xlu0 %85  ;;  %v206_v8 = vmul.f32 %v177_v49, %v103_v55 }
  0x86   :  { %v99_v10 = vsub.f32 %v27_v2, %v86_v34  ;;  %v100_v18 = vsub.f32 %v28_v9, %v91_v33 }
  0x88   :  { %v107_v19 = vmul.f32 %v99_v10, %v99_v10  ;;  %v108_v25 = vmul.f32 %v100_v18, %v100_v18 }
  0x8a   :  { %v155_v26 = vmul.f32 %v142_v37, %v107_v19 }
  0x8c   :  { %v192_v5 = vpop.permute.xlu2 %191 }
  0x8d   :  { %v122_v35 = vpop.permute.xlu1 %121  ;;  %v117_v36 = vpop.permute.xlu0 %116  ;;  %v209_v27 = vmul.f32 %v192_v5, %v106_v14 }
  0x8e   :  { %v150_v50 = vmul.f32 %v117_v36, %v102_v46  ;;  %v151_v60 = vmul.f32 %v122_v35, %v103_v55 }
  0x90   :  { %v157_v56 = vadd.f32 %v150_v50, %v149_v52 }
  0x92   :  { %v158_v1 = vadd.f32 %v157_v56, %v151_v60 }
  0x94   :  { %v159_v11 = vadd.f32 %v158_v1, %v152_v4  ;;  %v202_v28 = vpop.permute.xlu2 %201 }
  0x95   :  { %v137_v43 = vpop.permute.xlu1 %136  ;;  %v132_v44 = vpop.permute.xlu0 %131  ;;  %v211_v35 = vmul.f32 %v202_v28, %v108_v25 }
  0x96   :  { %v153_v6 = vmul.f32 %v132_v44, %v105_v0  ;;  %v154_v20 = vmul.f32 %v137_v43, %v106_v14 }
  0x98   :  { %v160_v15 = vadd.f32 %v159_v11, %v153_v6 }
  0x9a   :  { %v161_v23 = vadd.f32 %v160_v15, %v154_v20 }
  0x9c   :  { %v162_v34 = vadd.f32 %v161_v23, %v155_v26 }
  0x9d   :  { %v172_v57 = vpop.permute.xlu1 %171  ;;  %v167_v58 = vpop.permute.xlu0 %166 }
  0x9e   :  { %v205_v61 = vmul.f32 %v172_v57, %v102_v46  ;;  %v204_v62 = vmul.f32 %v167_v58, %v101_v45 }
  0xa0   :  { %v212_v7 = vadd.f32 %v205_v61, %v204_v62 }
  0xa2   :  { %v213_v17 = vadd.f32 %v212_v7, %v206_v8 }
  0xa5   :  { %v187_v12 = vpop.permute.xlu1 %186  ;;  %v182_v13 = vpop.permute.xlu0 %181 }
  0xa6   :  { %v207_v16 = vmul.f32 %v182_v13, %v104_v59  ;;  %v208_v21 = vmul.f32 %v187_v12, %v105_v0 }
  0xa8   :  { %v214_v22 = vadd.f32 %v213_v17, %v207_v16 }
  0xaa   :  { %v215_v24 = vadd.f32 %v214_v22, %v208_v21 }
  0xac   :  { %v216_v33 = vadd.f32 %v215_v24, %v209_v27 }
  0xad   :  { %v147_v29 = vpop.permute.xlu1 %146  ;;  %v197_v30 = vpop.permute.xlu0 %196 }
  0xae   :  { %v156_v31 = vmul.f32 %v147_v29, %v108_v25  ;;  %v210_v32 = vmul.f32 %v197_v30, %v107_v19 }
  0xb0   :  { %v217_v36 = vadd.f32 %v216_v33, %v210_v32  ;;  %v163_v37 = vadd.f32 %v162_v34, %v156_v31 }
  0xb2   :  { %221 = vst [vmem:[#allocation2] sm:$0xff] %v163_v37  ;;  %v218_v38 = vadd.f32 %v217_v36, %v211_v35 }
  0xb3   :  { %233 = dma.vmem_to_hbm [thread:$0]  %s229_s28, 128, %s231_s6, [#allocation3]  }
  0xb4   :  { %222 = vst [vmem:[#allocation4] sm:$0xff] %v218_v38 }
  0xb5   :  { %244 = dma.vmem_to_hbm [thread:$0]  %s240_s8, 128, %s242_s11, [#allocation5]  }
  0xb6   :  { %309 = dma.done.wait [#allocation3], 128  }
  0xb7   :  { %310 = vsyncadd [#allocation3], 4294967168 }
  0xb8   :  { %311 = dma.done.wait [#allocation5], 128  }
  0xb9   :  { %312 = vsyncadd [#allocation5], 4294967168 }
  0xba   :  { %253 = vsyncpa [#allocation3], 1 }
  0xbb   :  { %254 = vsyncpa [#allocation5], 1 }

</bundles_post_ra>
